<compile_context>
chip_gen: v7x
topology: tpu7x:2x2x1
jax: 0.10.0
libtpu: 0.0.40
codegen_flags: <defaults>
</compile_context>

<pallas_src>
import numpy as np
import jax
import jax.numpy as jnp
from jax import lax
from jax.experimental import pallas as pl
from jax.experimental.pallas import tpu as pltpu

_SQRT2 = np.float32(np.sqrt(2.0))
_SMALL_N = 2048  # <= this many rows -> single-row-block "small" kernel


def _round_up(v: int, m: int) -> int:
    return ((v + m - 1) // m) * m


def _round_down(v: int, m: int) -> int:
    return (v // m) * m


# --------------------------- small-N kernel --------------------------------
def _fourier_small_kernel(x_ref, f_ref, p_ref, o_ref):
    # x_ref: (N, 1) column; f_ref/p_ref: (1, TD) rows; o_ref: (N, TD)
    y = x_ref[...] * f_ref[...] + p_ref[...]
    o_ref[...] = (jnp.cos(y) * _SQRT2).astype(o_ref.dtype)


# --------------------------- large-N kernel --------------------------------
def _make_fourier_large_kernel(chunks_per_block: int, chunk_rows: int):
    def kernel(x_ref, f_ref, p_ref, o_ref):
        # x_ref: (1, chunks_per_block, chunk_rows)  -- lane-dense x rows
        # f_ref/p_ref: (TD, 1) columns of freqs / phases
        # o_ref: (chunks_per_block * chunk_rows, TD)
        f = f_ref[...]          # (TD, 1)
        p = p_ref[...]          # (TD, 1)

        def body(c, carry):
            x_c = x_ref[0, pl.ds(c, 1), :]                    # (1, CN), lane-dense
            y_t = jnp.cos(x_c * f + p) * _SQRT2               # (TD, CN): VPU/VALU
            # Aligned (TD, CN) -> (CN, TD) transpose (both dims multiples of
            # 128) on the XLU, so the store stays lane-dense along D.
            r0 = pl.multiple_of(c * chunk_rows, chunk_rows)
            o_ref[pl.ds(r0, chunk_rows), :] = (
                jnp.transpose(y_t).astype(o_ref.dtype))
            return carry

        lax.fori_loop(0, chunks_per_block, body, 0)

    return kernel


# --------------------------- wrapper ----------------------------------------
def fourier_embedding(x, freqs, phases, *, out_dtype=jnp.float32,
                      use_pallas=None, row_block=None, d_block=None):
    """Pallas TPU implementation of FourierEmbedding.forward.

    x: any shape / float dtype (flattened like torch.flatten).
    freqs, phases: (D,) buffers.
    Returns (x.size, D) of `out_dtype` (float32 default; bfloat16 is the
    recommended output on store-roofline-bound v5e).
    """
    f32 = jnp.float32
    x_flat = x.reshape(-1).astype(f32)
    n = int(x_flat.shape[0])
    d = int(freqs.shape[0])
    out_itemsize = np.dtype(out_dtype).itemsize

    if use_pallas is None:
        # Below a few hundred KiB of output, launch/pipeline overhead dominates.
        use_pallas = n * d * out_itemsize >= (256 << 10)
    if not use_pallas:
        y = (jnp.cos(x_flat[:, None] * freqs.astype(f32)[None, :]
                     + phases.astype(f32)[None, :]) * _SQRT2)
        return y.astype(out_dtype)

    d_pad = _round_up(d, 128)
    f_pad = jnp.pad(freqs.astype(f32), (0, d_pad - d))
    p_pad = jnp.pad(phases.astype(f32), (0, d_pad - d))

    cost = pl.CostEstimate(
        flops=2 * n * d,
        transcendentals=n * d,
        bytes_accessed=4 * n + 8 * d_pad + out_itemsize * n * d,
    )

    if d_block is not None:
        td = min(_round_up(int(d_block), 128), d_pad)
    else:
        td = min(d_pad, 1024)

    if n <= _SMALL_N:
        # ---- small-N path: column x, single (full) row block, grid over D --
        if d_block is None:
            # keep the resident output block around ~2 MiB of f32
            td = min(td, max(128, _round_down((2 << 20) // (4 * max(n, 1)), 128)))
        grid = (pl.cdiv(d, td),)
        return pl.pallas_call(
            _fourier_small_kernel,
            out_shape=jax.ShapeDtypeStruct((n, d), out_dtype),
            grid=grid,
            in_specs=[
                pl.BlockSpec((n, 1), lambda j: (0, 0)),
                pl.BlockSpec((1, td), lambda j: (0, j)),
                pl.BlockSpec((1, td), lambda j: (0, j)),
            ],
            out_specs=pl.BlockSpec((n, td), lambda j: (0, j)),
            compiler_params=pltpu.CompilerParams(
                dimension_semantics=("parallel",)),
            cost_estimate=cost,
        )(x_flat.reshape(n, 1), f_pad.reshape(1, d_pad), p_pad.reshape(1, d_pad))

    # ---- large-N path: lane-dense x, chunked transposed compute ------------
    # Chunk rows: multiple of 128, ~64K elements of compute per chunk so the
    # loop body stays ~64 vregs of straight-line code.
    cn = min(1024, max(128, _round_down((64 << 10) // td, 128)))
    if row_block is not None:
        tn = max(cn, _round_up(int(row_block), cn))
    else:
        # ~4 MiB (f32-equivalent) output block, but keep >= 4 row blocks when
        # N allows so v7x's two TensorCores / the DMA pipeline have work.
        tn = max(cn, min((4 << 20) // (4 * td), pl.cdiv(n, 4)))
        tn = _round_down(tn, cn) or cn
    tn = min(tn, max(cn, _round_down(n, cn)))   # block never larger than array
    cpb = tn // cn

    grid_n = pl.cdiv(n, tn)
    grid = (grid_n, pl.cdiv(d, td))

    rows_padded = grid_n * tn                    # pad x only (cheap); output stays (n, d)
    x_rows = jnp.pad(x_flat, (0, rows_padded - n)).reshape(grid_n, cpb, cn)

    kernel = _make_fourier_large_kernel(cpb, cn)
    return pl.pallas_call(
        kernel,
        out_shape=jax.ShapeDtypeStruct((n, d), out_dtype),
        grid=grid,
        in_specs=[
            pl.BlockSpec((1, cpb, cn), lambda i, j: (i, 0, 0)),   # x, lane-dense
            pl.BlockSpec((td, 1), lambda i, j: (j, 0)),           # freqs column
            pl.BlockSpec((td, 1), lambda i, j: (j, 0)),           # phases column
        ],
        out_specs=pl.BlockSpec((tn, td), lambda i, j: (i, j)),
        compiler_params=pltpu.CompilerParams(
            dimension_semantics=("parallel", "parallel")),
        cost_estimate=cost,
    )(x_rows, f_pad.reshape(d_pad, 1), p_pad.reshape(d_pad, 1))


# --------------------------- self-test ---------------------------------------
if __name__ == "__main__":
    key = jax.random.PRNGKey(0)
    k_x1, k_x2, k_f, k_p = jax.random.split(key, 4)

    embedding_dim = 128  # D

    # Deterministic stand-ins for the registered buffers:
    #   freqs  = 2*pi * randn(embedding_dim), phases = 2*pi * rand(embedding_dim)
    freqs = 2.0 * jnp.pi * jax.random.normal(k_f, (embedding_dim,), jnp.float32)
    phases = 2.0 * jnp.pi * jax.random.uniform(k_p, (embedding_dim,), jnp.float32)

    def ref_fn(xx):
        xf = xx.reshape(-1).astype(jnp.float32)
        return jnp.cos(xf[:, None] * freqs[None, :] + phases[None, :]) * _SQRT2

    # Case 1: tiny batch of diffusion timesteps -> small-N Pallas path
    # (column x, single full row block, grid over D). Forced onto the kernel.
    x1 = jax.random.normal(k_x1, (8,), jnp.float32)
    y1 = jax.block_until_ready(fourier_embedding(x1, freqs, phases, use_pallas=True))
    assert y1.shape == (8, embedding_dim) and y1.dtype == jnp.float32
    np.testing.assert_allclose(np.asarray(y1), np.asarray(ref_fn(x1)),
                               rtol=1e-5, atol=1e-5)

    # Case 2: non-1D input whose flattened length (3000) is not a multiple of
    # the row block -> large-N path: lane-dense x delivery, chunked transposed
    # compute, multi-block "parallel" row grid with a masked partial edge block.
    x2 = jax.random.normal(k_x2, (3, 1000), jnp.float32)
    y2 = jax.block_until_ready(fourier_embedding(x2, freqs, phases))
    assert y2.shape == (3000, embedding_dim) and y2.dtype == jnp.float32
    np.testing.assert_allclose(np.asarray(y2), np.asarray(ref_fn(x2)),
                               rtol=1e-5, atol=1e-5)

    # Case 3: bf16 output on the large-N path (the v5e store-bound recommendation).
    y3 = jax.block_until_ready(
        fourier_embedding(x2, freqs, phases, out_dtype=jnp.bfloat16))
    assert y3.shape == (3000, embedding_dim) and y3.dtype == jnp.bfloat16
    np.testing.assert_allclose(np.asarray(y3.astype(jnp.float32)),
                               np.asarray(ref_fn(x2)), rtol=0.02, atol=0.02)

    print("KERNEL_OK")
</pallas_src>

<mosaic_0001>
module attributes {stable_mosaic.version = 11 : i64} {
  func.func @_fourier_small_kernel(%arg0: i32, %arg1: memref<8x1xf32, #tpu.memory_space<vmem>>, %arg2: memref<1x128xf32, #tpu.memory_space<vmem>>, %arg3: memref<1x128xf32, #tpu.memory_space<vmem>>, %arg4: memref<8x128xf32, #tpu.memory_space<vmem>>) attributes {dimension_semantics = [#tpu.dimension_semantics<parallel>], iteration_bounds = array<i64: 1>, scalar_prefetch = 0 : i64, scratch_operands = 0 : i64, tpu.core_type = #tpu.core_type<tc>, window_params = [{pipeline_mode = #tpu.pipeline_mode<synchronous>, transform_indices = @transform_0, window_bounds = array<i64: 8, 1>}, {transform_indices = @transform_1, window_bounds = array<i64: 1, 128>}, {transform_indices = @transform_2, window_bounds = array<i64: 1, 128>}, {transform_indices = @transform_3, window_bounds = array<i64: 8, 128>}]} {
    %c0 = arith.constant 0 : index
    %c0_0 = arith.constant 0 : index
    %0 = vector.load %arg1[%c0, %c0_0] : memref<8x1xf32, #tpu.memory_space<vmem>>, vector<8x1xf32>
    %c0_1 = arith.constant 0 : index
    %c0_2 = arith.constant 0 : index
    %1 = vector.load %arg2[%c0_1, %c0_2] : memref<1x128xf32, #tpu.memory_space<vmem>>, vector<1x128xf32>
    %2 = vector.broadcast %0 : vector<8x1xf32> to vector<8x128xf32>
    %3 = vector.broadcast %1 : vector<1x128xf32> to vector<8x128xf32>
    %4 = arith.mulf %2, %3 : vector<8x128xf32>
    %c0_3 = arith.constant 0 : index
    %c0_4 = arith.constant 0 : index
    %5 = vector.load %arg3[%c0_3, %c0_4] : memref<1x128xf32, #tpu.memory_space<vmem>>, vector<1x128xf32>
    %6 = vector.broadcast %5 : vector<1x128xf32> to vector<8x128xf32>
    %7 = arith.addf %4, %6 : vector<8x128xf32>
    %8 = math.cos %7 : vector<8x128xf32>
    %cst = arith.constant 1.41421354 : f32
    %9 = vector.broadcast %cst : f32 to vector<8x128xf32>
    %10 = arith.mulf %8, %9 : vector<8x128xf32>
    %c0_5 = arith.constant 0 : index
    %c0_6 = arith.constant 0 : index
    %11 = vector.load %arg4[%c0_5, %c0_6] : memref<8x128xf32, #tpu.memory_space<vmem>>, vector<8x128xf32>
    tpu.vector_store %arg4[%c0_5, %c0_6], %10 {strides = array<i32>} : memref<8x128xf32, #tpu.memory_space<vmem>>, vector<8x128xf32>,
    return
  }
  func.func @transform_0(%arg0: i32) -> (i32, i32) {
    %c0_i32 = arith.constant 0 : i32
    %c0_i32_0 = arith.constant 0 : i32
    %c0_i32_1 = arith.constant 0 : i32
    return %c0_i32, %c0_i32_0 : i32, i32
  }
  func.func @transform_1(%arg0: i32) -> (i32, i32) {
    %c0_i32 = arith.constant 0 : i32
    %c0_i32_0 = arith.constant 0 : i32
    return %c0_i32, %arg0 : i32, i32
  }
  func.func @transform_2(%arg0: i32) -> (i32, i32) {
    %c0_i32 = arith.constant 0 : i32
    %c0_i32_0 = arith.constant 0 : i32
    return %c0_i32, %arg0 : i32, i32
  }
  func.func @transform_3(%arg0: i32) -> (i32, i32) {
    %c0_i32 = arith.constant 0 : i32
    %c0_i32_0 = arith.constant 0 : i32
    return %c0_i32, %arg0 : i32, i32
  }
}

</mosaic_0001>

<bundles_post_ra>
// kernel: tpu_custom_call.1
= control target key start
LH: loop header
LB: loop body
LE: loop exit
PB: predicated region body
PF: predicated region fallthrough
CT: control target
= control target key end

     0   :  { %v203_v1 = vmov 0   ;;  %s273_s0 = inlined_call_operand.vmem [shape: f32[8,1], index: 0, kind: input, shape index: {}]   ;;  %s274_s1 = inlined_call_operand.vmem [shape: f32[1,128], index: 1, kind: input, shape index: {}]   ;;  %s275_s2 = inlined_call_operand.vmem [shape: f32[1,128], index: 2, kind: input, shape index: {}]   ;;  %s276_s3 = inlined_call_operand.hbm [shape: f32[8,128], index: 3, kind: output, shape index: {}]  }
   0x1   :  { %v15_v0 = vld [vmem:[%s273_s0] sm:$0xff]  ;;  %174 = vset.pattern.permute.xlu0 %v203_v1 }
   0x2   :  { %19 = vperm.xlu0 %174, %v15_v0  }
   0x3   :  { %8 = vsyncpa [#allocation3], 0  ;;  %v156_v2 = vld [vmem:[%s274_s1] ss:$0 sm:$0xff]  ;;  %v204_v18 = vmov 2102212464  }
   0x4   :  { %v157_v3 = vld [vmem:[%s275_s2] ss:$0 sm:$0xff]  ;;  %v205_v20 = vmov 920167782   ;;  %v206_v24 = vmov 1326507024  }
   0x5   :  { %v207_v26 = vmov 683565275   ;;  %v208_v28 = vmov 2475754826   ;;  %v209_v31 = vmov 2131351028  }
   0x6   :  { %s210_s0 = smov [#allocation2]  }
   0x7   :  { %s148_s1 = sshll.u32 %s210_s0, 4  ;;  %s149_s1 = int_to_ptr.vmem [resolvable:$true] %s148_s1 }
   0x8   :  { %s179_s2 = scalar_lea.vmem %s149_s1, 128  ;;  %p184_p1 = scmp.lt.s32.totalorder %s149_s1, %s149_s1 }
   0x9   :  { %p180_p0 = scmp.ne.s32.totalorder %s149_s1, %s179_s2  ;;  %p185_p2 = scmp.lt.s32.totalorder %s179_s2, %s179_s2 }
   0xb   :  { %p186_p3 = por %p185_p2, %p184_p1 }
   0xd   :  { %p187_p4 = pnand %p186_p3, %p180_p0 }
  0x81   :  { %v20_v4 = vpop.permute.xlu0 %19 }
  0x82   :  { %v28_v5 = vmul.f32 %v156_v2, %v20_v4 }
  0x84   :  { %v240_v6 = vadd.f32 %v157_v3, %v28_v5 }
  0x86   :  { %v40_v7 = vand.u32 2139095040, %v240_v6  ;;  %v37_v8 = vand.u32 2147483647, %v240_v6  ;;  %vm39_vm7 = vcmp.lt.s32.totalorder %v240_v6, 0  ;;  %vm129_vm12 = vweird.f32 %v240_v6 }
  0x88   :  { %v41_v9 = vshrl.u32 %v40_v7, 23  ;;  %v44_v11 = vand.u32 8388607, %v37_v8  ;;  %vm38_vm8 = vcmp.le.f32.partialorder %v37_v8, 0.7853982 }
  0x8a   :  { %v158_v10 = vadd.s32 4294967169, %v41_v9  ;;  %v45_v14 = vor.u32 8388608, %v44_v11 }
  0x8c   :  { %v47_v12 = vadd.s32 1, %v158_v10  ;;  %v85_v22 = vshll.u32 %v45_v14, 8 }
  0x8e   :  { %vm48_vm0 = vcmp.gt.s32.totalorder %v47_v12, 0 }
  0x8f   :  { %v49_v13 = vsel %vm48_vm0, %v47_v12, 0 }
  0x90   :  { %v51_v15 = vand.u32 31, %v49_v13  ;;  %v50_v16 = vshrl.u32 %v49_v13, 5 }
  0x92   :  { %v52_v17 = vsub.s32 32, %v51_v15  ;;  %v63_v19 = vshll.u32 %v204_v18, %v51_v15  ;;  %v66_v21 = vshll.u32 %v205_v20, %v51_v15  ;;  %v54_v27 = vshll.u32 %v207_v26, %v51_v15 }
  0x93   :  { %v57_v30 = vshll.u32 %v208_v28, %v51_v15  ;;  %v60_v33 = vshll.u32 %v209_v31, %v51_v15  ;;  %vm72_vm1 = vcmp.lt.s32.totalorder %v50_v16, 4  ;;  %vm69_vm2 = vcmp.lt.s32.totalorder %v50_v16, 1 }
  0x94   :  { %v64_v23 = vshrl.u32 %v205_v20, %v52_v17  ;;  %v67_v25 = vshrl.u32 %v206_v24, %v52_v17  ;;  %v55_v29 = vshrl.u32 %v208_v28, %v52_v17  ;;  %v58_v32 = vshrl.u32 %v209_v31, %v52_v17 }
  0x95   :  { %v61_v34 = vshrl.u32 %v204_v18, %v52_v17  ;;  %v53_v38 = vshrl.u32 %v207_v26, %v52_v17  ;;  %vm70_vm3 = vcmp.lt.s32.totalorder %v50_v16, 2  ;;  %vm71_vm4 = vcmp.lt.s32.totalorder %v50_v16, 3 }
  0x96   :  { %v65_v35 = vor.u32 %v64_v23, %v63_v19  ;;  %v68_v36 = vor.u32 %v67_v25, %v66_v21  ;;  %v56_v37 = vor.u32 %v55_v29, %v54_v27  ;;  %v59_v39 = vor.u32 %v58_v32, %v57_v30 }
  0x97   :  { %v62_v40 = vor.u32 %v61_v34, %v60_v33 }
  0x98   :  { %v78_v41 = vsel %vm72_vm1, %v65_v35, 920167782  ;;  %v82_v42 = vsel %vm72_vm1, %v68_v36, 1326507024  ;;  %v77_v44 = vsel %vm69_vm2, %v56_v37, %v59_v39  ;;  %v73_v47 = vsel %vm69_vm2, %v53_v38, %v56_v37 }
  0x99   :  { %v74_v43 = vsel %vm72_vm1, %v62_v40, 2102212464  ;;  %v79_v45 = vsel %vm71_vm4, %v62_v40, %v78_v41  ;;  %v81_v46 = vsel %vm69_vm2, %v59_v39, %v62_v40  ;;  %v83_v50 = vsel %vm71_vm4, %v65_v35, %v82_v42 }
  0x9a   :  { %v75_v48 = vsel %vm71_vm4, %v59_v39, %v74_v43  ;;  %v80_v49 = vsel %vm70_vm3, %v77_v44, %v79_v45  ;;  %v84_v51 = vsel %vm70_vm3, %v81_v46, %v83_v50 }
  0x9b   :  { %v246_v52 = vmul.u32.u64.low %v85_v22, %v80_v49  ;;  %v247_v53 = vmul.u32.u64.high %v85_v22, %v80_v49, %v246_v52  ;;  %v249_v54 = vmul.u32.u64.low %v85_v22, %v84_v51  ;;  %v250_v55 = vmul.u32.u64.high %v85_v22, %v84_v51, %v249_v54 }
  0x9c   :  { %v76_v56 = vsel %vm70_vm3, %v73_v47, %v75_v48 }
  0x9d   :  { %v95_v57 = vadd.s32 1, %v247_v53  ;;  %v92_v58 = vmul.u32 %v85_v22, %v76_v56  ;;  %vm94_vm5 = vc.u32 %v250_v55, %v246_v52  ;;  %v93_v7 = vadd.s32 %v246_v52, %v250_v55 }
  0x9f   :  { %v96_v59 = vsel %vm94_vm5, %v95_v57, %v247_v53 }
  0xa0   :  { %v97_v60 = vadd.s32 %v96_v59, %v92_v58 }
  0xa2   :  { %v98_v61 = vadd.s32 536870912, %v97_v60 }
  0xa4   :  { %v99_v62 = vshrl.u32 %v98_v61, 30 }
  0xa6   :  { %v100_v63 = vshll.u32 %v99_v62, 30  ;;  %v123_v22 = vsub.s32 4, %v99_v62 }
  0xa8   :  { %v101_v0 = vsub.s32 %v97_v60, %v100_v63  ;;  %v124_v24 = vsel %vm39_vm7, %v123_v22, %v99_v62 }
  0xa9   :  { %v126_v25 = vsel %vm38_vm8, 0, %v124_v24 }
  0xaa   :  { %v103_v1 = vsub.s32 0, %v101_v0  ;;  %v130_v26 = vand.u32 3, %v126_v25 }
  0xac   :  { %v159_v2 = vmin.u32 %v103_v1, %v101_v0  ;;  %vm135_vm9 = vcmp.eq.s32.totalorder %v130_v26, 2  ;;  %vm132_vm10 = vcmp.eq.s32.totalorder %v130_v26, 0  ;;  %vm131_vm11 = vcmp.lt.s32.totalorder %v130_v26, 2 }
  0xae   :  { %v105_v3 = vclz %v159_v2 }
  0xb0   :  { %v160_v4 = vadd.s32 4294967294, %v105_v3 }
  0xb2   :  { %vm161_vm6 = vcmp.lt.s32.totalorder %v160_v4, 0 }
  0xb3   :  { %v108_v5 = vsel %vm161_vm6, 0, %v160_v4 }
  0xb4   :  { %v109_v9 = vsub.s32 32, %v108_v5  ;;  %v113_v10 = vsub.s32 4294967266, %v108_v5  ;;  %v110_v11 = vshll.u32 %v101_v0, %v108_v5 }
  0xb6   :  { %v111_v12 = vshrl.u32 %v93_v7, %v109_v9  ;;  %v114_v13 = vadd.s32 127, %v113_v10 }
  0xb8   :  { %v112_v14 = vor.u32 %v111_v12, %v110_v11  ;;  %v115_v15 = vshll.u32 %v114_v13, 23 }
  0xba   :  { %v116_v16 = vor.u32 4788187, %v115_v15  ;;  %v119_v18 = vcvt.s32.f32 %v112_v14 }
  0xbc   :  { %v117_v17 = vand.u32 2147483647, %v116_v16 }
  0xbe   :  { %v120_v19 = vmul.f32 %v119_v18, %v117_v17 }
  0xc0   :  { %v121_v20 = vxor.u32 2147483648, %v120_v19 }
  0xc2   :  { %v122_v21 = vsel %vm39_vm7, %v121_v20, %v120_v19 }
  0xc3   :  { %v125_v23 = vsel %vm38_vm8, %v240_v6, %v122_v21 }
  0xc4   :  { %175 = vcosq.f32 %v125_v23 }
  0xc5   :  { %177 = vsinq.f32 %v125_v23 }
  0xce   :  { %v176_v27 = vpop.eup %175 }
  0xcf   :  { %v178_v28 = vpop.eup %177  ;;  %v136_v29 = vxor.u32 2147483648, %v176_v27 }
  0xd0   :  { %v133_v30 = vxor.u32 2147483648, %v178_v28 }
  0xd1   :  { %v137_v31 = vsel %vm135_vm9, %v136_v29, %v178_v28 }
  0xd2   :  { %v134_v32 = vsel %vm132_vm10, %v176_v27, %v133_v30 }
  0xd3   :  { %v138_v8 = vsel %vm131_vm11, %v134_v32, %v137_v31 }
  0xd4   :  { %v139_v33 = vsel %vm129_vm12, nan, %v138_v8 }
  0xd5   :  { %v140_v34 = vmul.f32 1.4142135, %v139_v33 }
  0xd7   :  { %141 = vst [vmem:[#allocation2] sm:$0xff] %v140_v34 }
  0xd8   :  { %190 = shalt.err (!%p187_p4)
}
  0xd9   :  { %s191_s20 = scalar_lea.hbm %s276_s3, 128 }
  0xda   :  { %p192_p5 = scmp.ne.s32.totalorder %s276_s3, %s191_s20  ;;  %p195_p6 = scmp.lt.u32.totalorder %s191_s20, %s276_s3 }
  0xdc   :  { %p197_p7 = pnand %p195_p6, %p192_p5 }
  0xde   :  { %200 = shalt.err (!%p197_p7)
}
  0xdf   :  { %151 = dma.vmem_to_hbm [thread:$0]  %s149_s1, 128, %s276_s3, [#allocation3]  }
  0xe0   :  { %201 = dma.done.wait [#allocation3], 128  }
  0xe1   :  { %202 = vsyncadd [#allocation3], 4294967168 }
  0xe2   :  { %155 = vsyncpa [#allocation3], 1 }

</bundles_post_ra>
